<compile_context>
chip_gen: v6e
topology: v6e:2x2x1
jax: 0.10.0
libtpu: 0.0.40
codegen_flags: <defaults>
</compile_context>

<pallas_src>
import functools

import jax
import jax.numpy as jnp
from jax.experimental import pallas as pl
from jax.experimental.pallas import tpu as pltpu


# ----------------------------- Pallas kernel --------------------------------

def _relate_kernel(is_forward, attn_ref, beta_ref, gmat_ref, out_ref):
    # attn_ref: [rows, 128]   lane-dense rows; each row holds 128//Lg items
    # beta_ref: [1, 128]      beta[:L] replicated once per lane group (resident)
    # gmat_ref: [128, 128]    block-diagonal ones matrix for group sums (resident)
    x = attn_ref[...]
    beta = beta_ref[...]
    shifted = x + beta if is_forward else x - beta          # static mode branch

    # Row max over all 128 lanes: an upper bound for every lane group in the
    # row -> exp never overflows.  Frame-pad lanes hold -1e30 -> exp == 0.
    m = jnp.max(shifted, axis=-1, keepdims=True)            # [rows, 1]
    e = jnp.exp(shifted - m)                                 # EUP

    # Segmented (per lane-group) sum, broadcast back to every lane of its
    # group, via one MXU matmul with the block-diagonal ones matrix.
    denom = jnp.dot(e, gmat_ref[...], preferred_element_type=jnp.float32)
    denom = jnp.maximum(denom, jnp.float32(1e-30))           # guard vs. all-underflow groups
    out_ref[...] = e * pl.reciprocal(denom, approx=False)    # exact recip + mul (no divides)


# ------------------------------- wrapper -------------------------------------

def _round_up(x, m):
    return ((x + m - 1) // m) * m


def relate_module_forward(mode, attn, beta, *, max_rows_block=2048):
    """mode: 'forward' | anything else (subtracts, as in the PyTorch module)
    attn: [num_frames] or [batch, num_frames]; beta: [max_video_length]
    returns softmax(attn +/- beta[:num_frames]) with the same leading shape."""
    attn = jnp.asarray(attn, jnp.float32)
    single = attn.ndim == 1
    if single:
        attn = attn[None, :]
    B, L = attn.shape
    if L > 128:
        raise ValueError("num_frames > 128 not supported by this kernel")

    # Lane-group size: smallest power of two >= L (so groups tile 128 lanes).
    Lg = pl.next_power_of_2(L)
    g_per_row = 128 // Lg
    NEG = jnp.float32(-1e30)

    x = attn
    if Lg != L:                       # ragged-tail frame pad only (exp -> 0)
        x = jnp.pad(x, ((0, 0), (0, Lg - L)), constant_values=NEG)
    Bp = _round_up(B, g_per_row)      # batch pad so B*Lg is a multiple of 128
    if Bp != B:
        x = jnp.pad(x, ((0, Bp - B), (0, 0)))        # zero rows, sliced away later

    R = (Bp * Lg) // 128
    x = x.reshape(R, 128)             # free: contiguous reshape, no transpose

    # Row tiling: big tiles (up to max_rows_block x 128 x 4B = 1 MiB), grid
    # collapses for small inputs; >= 2 substantial steps for v7x's 2 TCs.
    n_steps = -(-R // max_rows_block)
    if n_steps == 1 and R >= 1024:
        n_steps = 2
    rows_block = _round_up(-(-R // n_steps), 8)
    R_pad = n_steps * rows_block
    if R_pad != R:
        x = jnp.pad(x, ((0, R_pad - R), (0, 0)))

    # beta[:L], replicated across the 128//Lg groups of one lane row (tiny).
    beta_l = jnp.asarray(beta, jnp.float32)[:L]
    beta_g = jnp.zeros((Lg,), jnp.float32).at[:L].set(beta_l)
    beta_row = jnp.tile(beta_g, g_per_row)[None, :]                  # [1, 128]

    # Block-diagonal ones matrix: segmented lane-sum + broadcast in one matmul.
    gids = jnp.arange(128, dtype=jnp.int32) // Lg
    gmat = (gids[:, None] == gids[None, :]).astype(jnp.float32)      # [128, 128]

    kernel = functools.partial(_relate_kernel, mode == 'forward')
    out = pl.pallas_call(
        kernel,
        out_shape=jax.ShapeDtypeStruct((R_pad, 128), jnp.float32),
        grid=(n_steps,),
        in_specs=[
            pl.BlockSpec((rows_block, 128), lambda i: (i, 0)),   # attn rows tile
            pl.BlockSpec((1, 128), lambda i: (0, 0)),            # beta row (VMEM-resident)
            pl.BlockSpec((128, 128), lambda i: (0, 0)),          # group matrix (VMEM-resident)
        ],
        out_specs=pl.BlockSpec((rows_block, 128), lambda i: (i, 0)),
        compiler_params=pltpu.CompilerParams(
            dimension_semantics=("parallel",)),                   # megacore over row tiles
    )(x, beta_row, gmat)

    out = out[:R].reshape(Bp, Lg)[:B, :L]     # no-op slices in the common case
    return out[0] if single else out


# ----------------------- pure-JAX reference (for checking) -------------------

def relate_module_reference(mode, attn, beta):
    attn = jnp.asarray(attn, jnp.float32)
    L = attn.shape[-1]
    b = jnp.asarray(beta, jnp.float32)[:L]
    shifted = attn + b if mode == 'forward' else attn - b
    return jax.nn.softmax(shifted, axis=-1)


# --------------------------------- main ---------------------------------------

if __name__ == "__main__":
    MAX_VIDEO_LENGTH = 8

    key = jax.random.PRNGKey(0)
    kb, k1, k2, k3 = jax.random.split(key, 4)
    beta = jax.random.uniform(kb, (MAX_VIDEO_LENGTH,), jnp.float32)   # ~ torch.rand

    cases = [
        ("forward",  jax.random.normal(k1, (256, 8), jnp.float32)),  # batched, pad-free fast path
        ("backward", jax.random.normal(k1, (256, 8), jnp.float32)),
        ("forward",  jax.random.normal(k2, (8,), jnp.float32)),      # exact PyTorch signature
        ("backward", jax.random.normal(k2, (8,), jnp.float32)),
        ("forward",  jax.random.normal(k3, (100, 6), jnp.float32)),  # ragged frames + batch pad
        ("backward", jax.random.normal(k3, (100, 6), jnp.float32)),
    ]

    ok = True
    for mode, attn in cases:
        out = jax.block_until_ready(relate_module_forward(mode, attn, beta))
        ref = relate_module_reference(mode, attn, beta)
        if not (out.shape == ref.shape and jnp.allclose(out, ref, atol=1e-5, rtol=1e-5)):
            ok = False
            print(f"mismatch: mode={mode} attn_shape={tuple(attn.shape)}")

    if ok:
        print("KERNEL_OK")
</pallas_src>

<mosaic_0001>
module attributes {stable_mosaic.version = 11 : i64} {
  func.func @_relate_kernel(%arg0: i32, %arg1: memref<16x128xf32, #tpu.memory_space<vmem>>, %arg2: memref<1x128xf32, #tpu.memory_space<vmem>>, %arg3: memref<128x128xf32, #tpu.memory_space<vmem>>, %arg4: memref<16x128xf32, #tpu.memory_space<vmem>>) attributes {dimension_semantics = [#tpu.dimension_semantics<parallel>], iteration_bounds = array<i64: 1>, scalar_prefetch = 0 : i64, scratch_operands = 0 : i64, tpu.core_type = #tpu.core_type<tc>, window_params = [{transform_indices = @transform_0, window_bounds = array<i64: 16, 128>}, {pipeline_mode = #tpu.pipeline_mode<synchronous>, transform_indices = @transform_1, window_bounds = array<i64: 1, 128>}, {pipeline_mode = #tpu.pipeline_mode<synchronous>, transform_indices = @transform_2, window_bounds = array<i64: 128, 128>}, {transform_indices = @transform_3, window_bounds = array<i64: 16, 128>}]} {
    %c0 = arith.constant 0 : index
    %c0_0 = arith.constant 0 : index
    %0 = vector.load %arg1[%c0, %c0_0] : memref<16x128xf32, #tpu.memory_space<vmem>>, vector<16x128xf32>
    %c0_1 = arith.constant 0 : index
    %c0_2 = arith.constant 0 : index
    %1 = vector.load %arg2[%c0_1, %c0_2] : memref<1x128xf32, #tpu.memory_space<vmem>>, vector<1x128xf32>
    %2 = vector.broadcast %1 : vector<1x128xf32> to vector<16x128xf32>
    %3 = arith.addf %0, %2 : vector<16x128xf32>
    %cst = arith.constant dense<0xFF800000> : vector<16xf32>
    %4 = vector.multi_reduction <maximumf>, %3, %cst [1] : vector<16x128xf32> to vector<16xf32>
    %5 = vector.shape_cast %4 : vector<16xf32> to vector<16x1xf32>
    %6 = vector.broadcast %5 : vector<16x1xf32> to vector<16x128xf32>
    %7 = arith.subf %3, %6 : vector<16x128xf32>
    %8 = math.exp %7 : vector<16x128xf32>
    %c0_3 = arith.constant 0 : index
    %c0_4 = arith.constant 0 : index
    %9 = vector.load %arg3[%c0_3, %c0_4] : memref<128x128xf32, #tpu.memory_space<vmem>>, vector<128x128xf32>
    %cst_5 = arith.constant dense<0.000000e+00> : vector<16x128xf32>
    %10 = tpu.matmul %8, %9, %cst_5 {dimension_numbers = #tpu.dot_dimension_numbers<[1], [0], [0], [1], [0, 0, 1, 1], [], []>} : vector<16x128xf32>, vector<128x128xf32>, vector<16x128xf32> -> vector<16x128xf32>
    %cst_6 = arith.constant 1.000000e-30 : f32
    %11 = vector.broadcast %cst_6 : f32 to vector<16x128xf32>
    %12 = arith.maximumf %10, %11 : vector<16x128xf32>
    %13 = tpu.reciprocal %12 : vector<16x128xf32> -> vector<16x128xf32>
    %14 = arith.mulf %8, %13 : vector<16x128xf32>
    %c0_7 = arith.constant 0 : index
    %c0_8 = arith.constant 0 : index
    %15 = vector.load %arg4[%c0_7, %c0_8] : memref<16x128xf32, #tpu.memory_space<vmem>>, vector<16x128xf32>
    tpu.vector_store %arg4[%c0_7, %c0_8], %14 {strides = array<i32>} : memref<16x128xf32, #tpu.memory_space<vmem>>, vector<16x128xf32>,
    return
  }
  func.func @transform_0(%arg0: i32) -> (i32, i32) {
    %c0_i32 = arith.constant 0 : i32
    %c0_i32_0 = arith.constant 0 : i32
    return %arg0, %c0_i32 : i32, i32
  }
  func.func @transform_1(%arg0: i32) -> (i32, i32) {
    %c0_i32 = arith.constant 0 : i32
    %c0_i32_0 = arith.constant 0 : i32
    %c0_i32_1 = arith.constant 0 : i32
    return %c0_i32, %c0_i32_0 : i32, i32
  }
  func.func @transform_2(%arg0: i32) -> (i32, i32) {
    %c0_i32 = arith.constant 0 : i32
    %c0_i32_0 = arith.constant 0 : i32
    %c0_i32_1 = arith.constant 0 : i32
    return %c0_i32, %c0_i32_0 : i32, i32
  }
  func.func @transform_3(%arg0: i32) -> (i32, i32) {
    %c0_i32 = arith.constant 0 : i32
    %c0_i32_0 = arith.constant 0 : i32
    return %arg0, %c0_i32 : i32, i32
  }
}

</mosaic_0001>

<bundles_post_ra>
// kernel: tpu_custom_call.1
= control target key start
LH: loop header
LB: loop body
LE: loop exit
PB: predicated region body
PF: predicated region fallthrough
CT: control target
= control target key end

     0   :  { %8 = vsyncpa [#allocation3], 0  ;;  %s360_s0 = inlined_call_operand.hbm [shape: f32[16,128], index: 0, kind: input, shape index: {}]   ;;  %s361_s1 = inlined_call_operand.vmem [shape: f32[1,128], index: 1, kind: input, shape index: {}]   ;;  %s362_s2 = inlined_call_operand.hbm [shape: f32[128,128], index: 2, kind: input, shape index: {}]   ;;  %s363_s3 = inlined_call_operand.hbm [shape: f32[16,128], index: 3, kind: output, shape index: {}]  }
   0x1   :  { %9 = vsyncpa [#allocation6], 0 }
   0x2   :  { %10 = vsyncpa [#allocation4], 0  ;;  %s314_s12 = smov [#allocation2]  }
   0x3   :  { %s16_s13 = sshll.u32 %s314_s12, 4  ;;  %s17_s13 = int_to_ptr.vmem [resolvable:$true] %s16_s13 }
   0x4   :  { %s256_s14 = scalar_lea.vmem %s17_s13, 256  ;;  %p261_p1 = scmp.lt.s32.totalorder %s17_s13, %s17_s13 }
   0x5   :  { %p257_p0 = scmp.ne.s32.totalorder %s17_s13, %s256_s14  ;;  %p262_p2 = scmp.lt.s32.totalorder %s256_s14, %s256_s14 }
   0x7   :  { %p263_p3 = por %p262_p2, %p261_p1 }
   0x9   :  { %p264_p4 = pnand %p263_p3, %p257_p0 }
   0xb   :  { %267 = shalt.err (!%p264_p4)
}
   0xc   :  { %s315_s15 = smov 128   ;;  %s316_s16 = smov 8  }
   0xd   :  { %22 = dma.hbm_to_vmem [thread:$0]  %s360_s0, 256, %s17_s13, [#allocation3], %s315_s15, %s315_s15, %s316_s16  }
   0xe   :  { %s317_s19 = smov [#allocation5]  }
   0xf   :  { %s30_s20 = sshll.u32 %s317_s19, 4  ;;  %s31_s20 = int_to_ptr.vmem [resolvable:$true] %s30_s20 }
  0x10   :  { %s276_s21 = scalar_lea.vmem %s31_s20, 2048  ;;  %p281_p6 = scmp.lt.s32.totalorder %s31_s20, %s31_s20 }
  0x11   :  { %p277_p5 = scmp.ne.s32.totalorder %s31_s20, %s276_s21  ;;  %p282_p7 = scmp.lt.s32.totalorder %s276_s21, %s276_s21 }
  0x13   :  { %p283_p8 = por %p282_p7, %p281_p6 }
  0x15   :  { %p284_p9 = pnand %p283_p8, %p277_p5 }
  0x17   :  { %287 = shalt.err (!%p284_p9)
}
  0x18   :  { %36 = dma.hbm_to_vmem [thread:$0]  %s362_s2, 2048, %s31_s20, [#allocation6], %s315_s15, %s315_s15, %s316_s16  }
  0x19   :  { %308 = dma.done.wait [#allocation3], 256  }
  0x1a   :  { %309 = vsyncadd [#allocation3], 4294967040 }
  0x1b   :  { %310 = dma.done.wait [#allocation6], 2048  }
  0x1c   :  { %311 = vsyncadd [#allocation6], 4294965248  ;;  %v43_v0 = vld [vmem:[#allocation2] sm:$0xff]  ;;  %v44_v2 = vld [vmem:[#allocation2 + $0x8] sm:$0xff] }
  0x1d   :  { %v181_v1 = vld [vmem:[%s361_s1] ss:$0 sm:$0xff]  ;;  %v79_v4 = vld [vmem:[#allocation5 + $0x78] sm:$0xff]  ;;  %v77_v7 = vld [vmem:[#allocation5 + $0x68] sm:$0xff]  ;;  %s318_s1 = smov [#allocation7]  }
  0x1e   :  { %v52_v3 = vadd.f32 %v181_v1, %v43_v0  ;;  %v78_v5 = vld [vmem:[#allocation5 + $0x70] sm:$0xff]  ;;  %200 = vmatprep.subr.mxu0 %v79_v4  ;;  %v53_v6 = vadd.f32 %v181_v1, %v44_v2  ;;  %v76_v8 = vld [vmem:[#allocation5 + $0x60] sm:$0xff]  ;;  %v75_v9 = vld [vmem:[#allocation5 + $0x58] sm:$0xff]  ;;  %s168_s2 = sshll.u32 %s318_s1, 4  ;;  %s169_s2 = int_to_ptr.vmem [resolvable:$true] %s168_s2 }
  0x1f   :  { %201 = vmatpush3.msra.mxu0 %v79_v4  ;;  %v74_v10 = vld [vmem:[#allocation5 + $0x50] sm:$0xff]  ;;  %v73_v11 = vld [vmem:[#allocation5 + $0x48] sm:$0xff]  ;;  %v72_v12 = vld [vmem:[#allocation5 + $0x40] sm:$0xff]  ;;  %s288_s25 = scalar_lea.vmem %s169_s2, 256  ;;  %p293_p11 = scmp.lt.s32.totalorder %s169_s2, %s169_s2 }
  0x20   :  { %54 = vmax.xlane.f32.xlu0 %v52_v3  ;;  %202 = vmatprep.subr.mxu0 %v78_v5  ;;  %v71_v13 = vld [vmem:[#allocation5 + $0x38] sm:$0xff]  ;;  %v70_v14 = vld [vmem:[#allocation5 + $0x30] sm:$0xff]  ;;  %v69_v15 = vld [vmem:[#allocation5 + $0x28] sm:$0xff]  ;;  %p289_p10 = scmp.ne.s32.totalorder %s169_s2, %s288_s25  ;;  %p294_p12 = scmp.lt.s32.totalorder %s288_s25, %s288_s25 }
  0x21   :  { %203 = vmatpush3.msra.mxu0 %v78_v5  ;;  %v68_v16 = vld [vmem:[#allocation5 + $0x20] sm:$0xff]  ;;  %v67_v17 = vld [vmem:[#allocation5 + $0x18] sm:$0xff]  ;;  %v66_v18 = vld [vmem:[#allocation5 + $0x10] sm:$0xff] }
  0x22   :  { %204 = vmatprep.subr.mxu0 %v77_v7  ;;  %v65_v19 = vld [vmem:[#allocation5 + $0x8] sm:$0xff]  ;;  %v64_v20 = vld [vmem:[#allocation5] sm:$0xff]  ;;  %p295_p13 = por %p294_p12, %p293_p11 }
  0x23   :  { %205 = vmatpush3.msra.mxu0 %v77_v7 }
  0x24   :  { %56 = vmax.xlane.f32.xlu0 %v53_v6  ;;  %206 = vmatprep.subr.mxu0 %v76_v8  ;;  %p296_p0 = pnand %p295_p13, %p289_p10 }
  0x25   :  { %207 = vmatpush3.msra.mxu0 %v76_v8 }
  0x26   :  { %208 = vmatprep.subr.mxu0 %v75_v9 }
  0x27   :  { %209 = vmatpush3.msra.mxu0 %v75_v9 }
  0x28   :  { %210 = vmatprep.subr.mxu0 %v74_v10 }
  0x29   :  { %211 = vmatpush3.msra.mxu0 %v74_v10 }
  0x2a   :  { %212 = vmatprep.subr.mxu0 %v73_v11 }
  0x2b   :  { %213 = vmatpush3.msra.mxu0 %v73_v11 }
  0x2c   :  { %214 = vmatprep.subr.mxu0 %v72_v12 }
  0x2d   :  { %215 = vmatpush3.msra.mxu0 %v72_v12 }
  0x2e   :  { %216 = vmatprep.subr.mxu0 %v71_v13 }
  0x2f   :  { %217 = vmatpush3.msra.mxu0 %v71_v13 }
  0x30   :  { %218 = vmatprep.subr.mxu0 %v70_v14 }
  0x31   :  { %219 = vmatpush3.msra.mxu0 %v70_v14 }
  0x32   :  { %220 = vmatprep.subr.mxu0 %v69_v15 }
  0x33   :  { %221 = vmatpush3.msra.mxu0 %v69_v15 }
  0x34   :  { %222 = vmatprep.subr.mxu0 %v68_v16 }
  0x35   :  { %223 = vmatpush3.msra.mxu0 %v68_v16 }
  0x36   :  { %224 = vmatprep.subr.mxu0 %v67_v17 }
  0x37   :  { %225 = vmatpush3.msra.mxu0 %v67_v17 }
  0x38   :  { %226 = vmatprep.subr.mxu0 %v66_v18 }
  0x39   :  { %227 = vmatpush3.msra.mxu0 %v66_v18 }
  0x3a   :  { %228 = vmatprep.subr.mxu0 %v65_v19 }
  0x3b   :  { %229 = vmatpush3.msra.mxu0 %v65_v19 }
  0x3c   :  { %230 = vmatprep.subr.mxu0 %v64_v20 }
  0x3d   :  { %231 = vmatpush3.msra.mxu0 %v64_v20 }
  0xa9   :  { %v55_v21 = vpop.xlane.xlu0 %54 }
  0xaa   :  { %v58_v22 = vsub.f32 %v52_v3, %v55_v21 }
  0xac   :  { %v60_v23 = vmul.f32 1.442695, %v58_v22 }
  0xad   :  { %v57_v24 = vpop.xlane.xlu0 %56 }
  0xae   :  { %240 = vpow2.f32 %v60_v23  ;;  %v59_v25 = vsub.f32 %v53_v6, %v57_v24 }
  0xb0   :  { %v62_v26 = vmul.f32 1.442695, %v59_v25 }
  0xb2   :  { %242 = vpow2.f32 %v62_v26 }
  0xbb   :  { %v241_v27 = vpop.eup %240 }
  0xbc   :  { %232 = vmatprep.mubr.f32.mxu0 %v241_v27 }
  0xbf   :  { %v243_v28 = vpop.eup %242 }
  0xc0   :  { %233 = vmatmul.mubr.f32.vlgmr.msra.gmra.mxu0 %v243_v28 }
 0x180   :  { %v234_v29 = vpop.f32.mrf.mxu0 }
 0x181   :  { %v156_v30 = vmax.f32 %v234_v29, 1e-30 }
 0x182   :  { %v146_v31 = vpop.f32.mrf.mxu0 }
 0x183   :  { %244 = vrcp.f32 %v156_v30  ;;  %v155_v32 = vmax.f32 %v146_v31, 1e-30 }
 0x185   :  { %246 = vrcp.f32 %v155_v32 }
 0x190   :  { %v245_v33 = vpop.eup %244 }
 0x191   :  { %v160_v34 = vmul.f32 %v245_v33, %v243_v28 }
 0x192   :  { %v247_v35 = vpop.eup %246 }
 0x193   :  { %v159_v36 = vmul.f32 %v247_v35, %v241_v27  ;;  %162 = vst [vmem:[#allocation7 + $0x8] sm:$0xff] %v160_v34 }
 0x195   :  { %161 = vst [vmem:[#allocation7] sm:$0xff] %v159_v36 }
 0x196   :  { %299 = shalt.err (!%p296_p0)
}
 0x197   :  { %174 = dma.vmem_to_hbm [thread:$0]  %s169_s2, 256, %s363_s3, [#allocation4], %s315_s15, %s315_s15, %s316_s16  }
 0x198   :  { %312 = dma.done.wait [#allocation4], 256  }
 0x199   :  { %313 = vsyncadd [#allocation4], 4294967040 }
 0x19a   :  { %178 = vsyncpa [#allocation3], 1 }
 0x19b   :  { %179 = vsyncpa [#allocation6], 1 }
 0x19c   :  { %180 = vsyncpa [#allocation4], 1 }

</bundles_post_ra>
